<compile_context>
chip_gen: v6e
topology: v6e:2x2x1
jax: 0.10.0
libtpu: 0.0.40
codegen_flags: <defaults>
</compile_context>

<pallas_src>
import functools

import jax
import jax.numpy as jnp
import numpy as np
from jax import lax
from jax.experimental import pallas as pl
from jax.experimental.pallas import tpu as pltpu

_ROWS = 8  # timesteps processed per aligned load/store block


def hist_htcn_kernel(x_ref, w_ref, kh_ref, aw_ref, gw_ref, be_ref, bg_ref,
                     out_ref, sconv_ref, state_ref, *, T_no):
    TC, C = out_ref.shape
    nblk = TC // _ROWS

    # Zero the carried recurrence state on the first time chunk only.
    @pl.when(pl.program_id(0) == 0)
    def _init():
        state_ref[...] = jnp.zeros_like(state_ref)

    # Synaptic causal conv for this chunk: one im2col matmul on the MXU,
    # completely off the serial recurrence path.
    sconv_ref[...] = jnp.dot(x_ref[...], w_ref[...],
                             preferred_element_type=jnp.float32)

    # Small per-step constants, hoisted (loaded once per chunk, live in vregs).
    kh_rows = [kh_ref[tau:tau + 1, :] for tau in range(T_no)]     # T_no x (1, C)
    aw = aw_ref[...]                                              # (C, C)
    gw = gw_ref[...]                                              # (C, C)
    bexp = be_ref[...]                                            # (1, C)
    bg = bg_ref[...]                                              # (1, C)

    # Carried state: T_no history rows (expanded lanes) + next-step leaf input.
    rows0 = tuple(state_ref[tau:tau + 1, :] for tau in range(T_no))
    leaf0 = state_ref[T_no:T_no + 1, :]

    def body(blk, carry):
        rows_t, leaf_in = carry
        rows = list(rows_t)
        base = pl.multiple_of(blk * _ROWS, _ROWS)
        syn_blk = sconv_ref[pl.ds(base, _ROWS), :]                # aligned (8, C) load
        out_rows = []
        for j in range(_ROWS):                                    # static, unrolled
            # history conv: T_no register-resident FMAs on (1, C)
            hist = rows[0] * kh_rows[0]
            for tau in range(1, T_no):
                hist = hist + rows[tau] * kh_rows[tau]
            nl = jnp.tanh(syn_blk[j:j + 1, :] + leaf_in + hist)   # EUP
            # two *independent* tiny matmuls (fused weights) -> no serial chain
            plex = jnp.dot(nl, aw, preferred_element_type=jnp.float32) + bexp
            leaf_in = jnp.dot(nl, gw, preferred_element_type=jnp.float32) + bg
            rows.pop(0)
            rows.append(plex)                                     # register shift, free
            out_rows.append(plex)
        # one aligned (8, C) store per 8 steps instead of 8 masked stores
        out_ref[pl.ds(base, _ROWS), :] = jnp.concatenate(out_rows, axis=0)
        return (tuple(rows), leaf_in)

    rows, leaf_in = lax.fori_loop(0, nblk, body, (rows0, leaf0))

    # persist the recurrence state for the next time chunk (once per chunk)
    state_ref[...] = jnp.concatenate(list(rows) + [leaf_in], axis=0)


def hist_htcn_forward(S_e, S_i, params, C_den, C_syn_e, C_syn_i,
                      T_no, M_no, B_no, time_chunk=256):
    f32 = jnp.float32
    sub_no = C_den.shape[0]
    E_no = C_syn_e.shape[1]
    I_no = C_syn_i.shape[1]
    C = sub_no * M_no
    K = T_no * (E_no + I_no)
    T = S_e.shape[0]

    # --- time-chunking (chunk is a multiple of 8; pad T up to a chunk multiple)
    TC = min(max(time_chunk, _ROWS), ((T + _ROWS - 1) // _ROWS) * _ROWS)
    TC = ((TC + _ROWS - 1) // _ROWS) * _ROWS
    Tp = ((T + TC - 1) // TC) * TC
    n_chunks = Tp // TC

    # --- basis-expanded conv kernels, lane layout c = s*M_no + m
    ke = (params['conv1_e_weights'] @ params['conv1_e_bases']).T.astype(f32)   # (T_no, C)
    ki = (params['conv1_i_weights'] @ params['conv1_i_bases']).T.astype(f32)   # (T_no, C)
    kh = (params['conv_hist_weights'] @ params['conv_hist_bases']).T.astype(f32)

    # projection matrices expanded per lane
    ce_exp = jnp.repeat(C_syn_e.astype(f32), M_no, axis=0).T                   # (E_no, C)
    ci_exp = jnp.repeat(C_syn_i.astype(f32), M_no, axis=0).T                   # (I_no, C)

    # fused im2col conv weight: W[(tau,e), c] = kern[tau, c] * proj[e, c]
    W_e = (ke[:, None, :] * ce_exp[None, :, :]).reshape(T_no * E_no, C)
    W_i = (ki[:, None, :] * ci_exp[None, :, :]).reshape(T_no * I_no, C)
    W = jnp.concatenate([W_e, W_i], axis=0)                                    # (K, C)

    # im2col input: X[t, tau*E + e] = spikes_padded[t + tau, e]
    se_pad = jnp.concatenate([jnp.zeros((T_no - 1, E_no), f32),
                              S_e.astype(f32),
                              jnp.zeros((Tp - T, E_no), f32)], axis=0)
    si_pad = jnp.concatenate([jnp.zeros((T_no - 1, I_no), f32),
                              S_i.astype(f32),
                              jnp.zeros((Tp - T, I_no), f32)], axis=0)
    Xe = jnp.stack([se_pad[tau:tau + Tp, :] for tau in range(T_no)],
                   axis=1).reshape(Tp, T_no * E_no)
    Xi = jnp.stack([si_pad[tau:tau + Tp, :] for tau in range(T_no)],
                   axis=1).reshape(Tp, T_no * I_no)
    X = jnp.concatenate([Xe, Xi], axis=1)                                      # (Tp, K)

    # --- fused mixing matrices for the flattened lane layout
    A = jnp.kron(jnp.eye(sub_no, dtype=f32), jnp.ones((M_no, M_no), f32))      # multiplex sum
    Bm = jnp.kron(C_den.T.astype(f32), jnp.eye(M_no, dtype=f32))               # dendritic mixing
    lflat = params['leaf_linear'].reshape(1, C).astype(f32)
    wflat = params['multiplex_linear'].reshape(1, C).astype(f32)
    bexp = jnp.repeat(params['multiplex_bias'].astype(f32), M_no).reshape(1, C)

    Bm_l = lflat.reshape(C, 1) * Bm          # diag(l) @ Bm
    A_w = wflat.reshape(C, 1) * A            # diag(w) @ A           -> plex
    G_w = A_w @ Bm_l                         # diag(w) @ A @ diag(l) @ Bm -> next leaf_in
    b_g = bexp @ Bm_l                        # bias contribution to next leaf_in

    kernel = functools.partial(hist_htcn_kernel, T_no=T_no)

    out = pl.pallas_call(
        kernel,
        out_shape=jax.ShapeDtypeStruct((Tp, C), f32),
        grid=(n_chunks,),
        in_specs=[
            pl.BlockSpec((TC, K), lambda i: (i, 0)),       # im2col inputs, pipelined
            pl.BlockSpec((K, C), lambda i: (0, 0)),        # fused conv weight (resident)
            pl.BlockSpec((T_no, C), lambda i: (0, 0)),     # history kernel
            pl.BlockSpec((C, C), lambda i: (0, 0)),        # A_w
            pl.BlockSpec((C, C), lambda i: (0, 0)),        # G_w
            pl.BlockSpec((1, C), lambda i: (0, 0)),        # bexp
            pl.BlockSpec((1, C), lambda i: (0, 0)),        # b_g
        ],
        out_specs=pl.BlockSpec((TC, C), lambda i: (i, 0)),
        scratch_shapes=[
            pltpu.VMEM((TC, C), f32),           # S_conv for the current chunk
            pltpu.VMEM((T_no + 1, C), f32),     # carried history window + leaf_in
        ],
        compiler_params=pltpu.CompilerParams(
            dimension_semantics=("arbitrary",)),
    )(X, W, kh, A_w, G_w, bexp, b_g)

    # lane 0 == (subunit 0, mixture 0), which carries sub_out[:, 0]
    return out[:T, 0]


def reference_forward(S_e, S_i, params, C_den, C_syn_e, C_syn_i, T_no, M_no):
    """Pure-numpy re-implementation of the PyTorch forward (float64)."""
    S_e = np.asarray(S_e, np.float64)
    S_i = np.asarray(S_i, np.float64)
    p = {k: np.asarray(v, np.float64) for k, v in params.items()}
    C_den = np.asarray(C_den, np.float64)
    C_syn_e = np.asarray(C_syn_e, np.float64)
    C_syn_i = np.asarray(C_syn_i, np.float64)
    sub_no = C_den.shape[0]
    T = S_e.shape[0]

    proj_e = S_e @ C_syn_e.T
    proj_i = S_i @ C_syn_i.T
    kern_e = p['conv1_e_weights'] @ p['conv1_e_bases']
    kern_i = p['conv1_i_weights'] @ p['conv1_i_bases']
    kern_h = p['conv_hist_weights'] @ p['conv_hist_bases']

    pe = np.concatenate([np.zeros((T_no - 1, sub_no)), proj_e], axis=0)
    pi = np.concatenate([np.zeros((T_no - 1, sub_no)), proj_i], axis=0)
    S_conv = np.zeros((T, sub_no, M_no))
    for t in range(T):
        for s in range(sub_no):
            for m in range(M_no):
                S_conv[t, s, m] = ((kern_e[s * M_no + m] * pe[t:t + T_no, s]).sum()
                                   + (kern_i[s * M_no + m] * pi[t:t + T_no, s]).sum())

    sub_out = np.zeros((T + T_no, sub_no))
    for t in range(T):
        window = sub_out[t:t + T_no, :]
        hist = np.zeros((sub_no, M_no))
        for s in range(sub_no):
            for m in range(M_no):
                hist[s, m] = (kern_h[s * M_no + m] * window[:, s]).sum()
        leaf_out = sub_out[t + T_no - 1]
        leaf_in = C_den @ (leaf_out[:, None] * p['leaf_linear'])
        nl = np.tanh(S_conv[t] + leaf_in + hist)
        plex = (nl * p['multiplex_linear']).sum(1) + p['multiplex_bias']
        sub_out[t + T_no] = plex
    return sub_out[T_no:, 0]


if __name__ == "__main__":
    sub_no, E_no, I_no = 4, 8, 6
    T_no, M_no, B_no = 8, 4, 4
    T_data = 32
    scale = 0.3

    key = jax.random.PRNGKey(0)
    keys = jax.random.split(key, 16)

    C_den = (jax.random.normal(keys[0], (sub_no, sub_no)) * scale).astype(jnp.float32)
    C_syn_e = (jax.random.normal(keys[1], (sub_no, E_no)) * scale).astype(jnp.float32)
    C_syn_i = (jax.random.normal(keys[2], (sub_no, I_no)) * scale).astype(jnp.float32)

    params = {
        'conv1_e_bases':     (jax.random.normal(keys[3], (B_no, T_no)) * scale).astype(jnp.float32),
        'conv1_e_weights':   (jax.random.normal(keys[4], (M_no * sub_no, B_no)) * scale).astype(jnp.float32),
        'conv1_i_bases':     (jax.random.normal(keys[5], (B_no, T_no)) * scale).astype(jnp.float32),
        'conv1_i_weights':   (jax.random.normal(keys[6], (M_no * sub_no, B_no)) * scale).astype(jnp.float32),
        'conv_hist_bases':   (jax.random.normal(keys[7], (B_no, T_no)) * scale).astype(jnp.float32),
        'conv_hist_weights': (jax.random.normal(keys[8], (sub_no * M_no, B_no)) * scale).astype(jnp.float32),
        'leaf_linear':       (jax.random.normal(keys[9], (sub_no, M_no)) * scale).astype(jnp.float32),
        'multiplex_linear':  (jax.random.normal(keys[10], (sub_no, M_no)) * scale).astype(jnp.float32),
        'multiplex_bias':    (jax.random.normal(keys[11], (sub_no,)) * scale).astype(jnp.float32),
    }

    S_e = jax.random.bernoulli(keys[12], 0.2, (T_data, E_no)).astype(jnp.float32)
    S_i = jax.random.bernoulli(keys[13], 0.2, (T_data, I_no)).astype(jnp.float32)

    # time_chunk=16 -> 2 time chunks, exercising the carried-history grid path
    out = hist_htcn_forward(S_e, S_i, params, C_den, C_syn_e, C_syn_i,
                            T_no, M_no, B_no, time_chunk=16)
    out = jax.block_until_ready(out)

    ref = reference_forward(S_e, S_i, params, C_den, C_syn_e, C_syn_i, T_no, M_no)
    np.testing.assert_allclose(np.asarray(out), ref, rtol=1e-2, atol=1e-3)
    print("KERNEL_OK")
</pallas_src>

<mosaic_0001>
module attributes {stable_mosaic.version = 11 : i64} {
  func.func @hist_htcn_kernel(%arg0: i32, %arg1: memref<16x112xf32, #tpu.memory_space<vmem>>, %arg2: memref<112x16xf32, #tpu.memory_space<vmem>>, %arg3: memref<8x16xf32, #tpu.memory_space<vmem>>, %arg4: memref<16x16xf32, #tpu.memory_space<vmem>>, %arg5: memref<16x16xf32, #tpu.memory_space<vmem>>, %arg6: memref<1x16xf32, #tpu.memory_space<vmem>>, %arg7: memref<1x16xf32, #tpu.memory_space<vmem>>, %arg8: memref<16x16xf32, #tpu.memory_space<vmem>>, %arg9: memref<16x16xf32, #tpu.memory_space<vmem>>, %arg10: memref<9x16xf32, #tpu.memory_space<vmem>>) attributes {dimension_semantics = [#tpu.dimension_semantics<arbitrary>], iteration_bounds = array<i64: 2>, scalar_prefetch = 0 : i64, scratch_operands = 2 : i64, tpu.core_type = #tpu.core_type<tc>, window_params = [{transform_indices = @transform_0, window_bounds = array<i64: 16, 112>}, {pipeline_mode = #tpu.pipeline_mode<synchronous>, transform_indices = @transform_1, window_bounds = array<i64: 112, 16>}, {pipeline_mode = #tpu.pipeline_mode<synchronous>, transform_indices = @transform_2, window_bounds = array<i64: 8, 16>}, {pipeline_mode = #tpu.pipeline_mode<synchronous>, transform_indices = @transform_3, window_bounds = array<i64: 16, 16>}, {pipeline_mode = #tpu.pipeline_mode<synchronous>, transform_indices = @transform_4, window_bounds = array<i64: 16, 16>}, {pipeline_mode = #tpu.pipeline_mode<synchronous>, transform_indices = @transform_5, window_bounds = array<i64: 1, 16>}, {pipeline_mode = #tpu.pipeline_mode<synchronous>, transform_indices = @transform_6, window_bounds = array<i64: 1, 16>}, {transform_indices = @transform_7, window_bounds = array<i64: 16, 16>}]} {
    %c0_i32 = arith.constant 0 : i32
    %0 = arith.cmpi eq, %arg0, %c0_i32 : i32
    %1 = arith.extui %0 : i1 to i32
    %c0_i32_0 = arith.constant 0 : i32
    %2 = arith.cmpi ne, %1, %c0_i32_0 : i32
    scf.if %2 {
      %cst_44 = arith.constant 0.000000e+00 : f32
      %32 = vector.broadcast %cst_44 : f32 to vector<9x16xf32>
      %c0_45 = arith.constant 0 : index
      %c0_46 = arith.constant 0 : index
      %33 = vector.load %arg10[%c0_45, %c0_46] : memref<9x16xf32, #tpu.memory_space<vmem>>, vector<9x16xf32>
      tpu.vector_store %arg10[%c0_45, %c0_46], %32 {strides = array<i32>} : memref<9x16xf32, #tpu.memory_space<vmem>>, vector<9x16xf32>,
    } else {
    }
    %c0 = arith.constant 0 : index
    %c0_1 = arith.constant 0 : index
    %3 = vector.load %arg1[%c0, %c0_1] : memref<16x112xf32, #tpu.memory_space<vmem>>, vector<16x112xf32>
    %c0_2 = arith.constant 0 : index
    %c0_3 = arith.constant 0 : index
    %4 = vector.load %arg2[%c0_2, %c0_3] : memref<112x16xf32, #tpu.memory_space<vmem>>, vector<112x16xf32>
    %cst = arith.constant dense<0.000000e+00> : vector<16x16xf32>
    %5 = tpu.matmul %3, %4, %cst {dimension_numbers = #tpu.dot_dimension_numbers<[1], [0], [0], [1], [0, 0, 1, 1], [], []>} : vector<16x112xf32>, vector<112x16xf32>, vector<16x16xf32> -> vector<16x16xf32>
    %c0_4 = arith.constant 0 : index
    %c0_5 = arith.constant 0 : index
    %6 = vector.load %arg9[%c0_4, %c0_5] : memref<16x16xf32, #tpu.memory_space<vmem>>, vector<16x16xf32>
    tpu.vector_store %arg9[%c0_4, %c0_5], %5 {strides = array<i32>} : memref<16x16xf32, #tpu.memory_space<vmem>>, vector<16x16xf32>,
    %c0_6 = arith.constant 0 : index
    %c0_7 = arith.constant 0 : index
    %7 = vector.load %arg3[%c0_6, %c0_7] : memref<8x16xf32, #tpu.memory_space<vmem>>, vector<1x16xf32>
    %c1 = arith.constant 1 : index
    %c0_8 = arith.constant 0 : index
    %8 = vector.load %arg3[%c1, %c0_8] : memref<8x16xf32, #tpu.memory_space<vmem>>, vector<1x16xf32>
    %c2 = arith.constant 2 : index
    %c0_9 = arith.constant 0 : index
    %9 = vector.load %arg3[%c2, %c0_9] : memref<8x16xf32, #tpu.memory_space<vmem>>, vector<1x16xf32>
    %c3 = arith.constant 3 : index
    %c0_10 = arith.constant 0 : index
    %10 = vector.load %arg3[%c3, %c0_10] : memref<8x16xf32, #tpu.memory_space<vmem>>, vector<1x16xf32>
    %c4 = arith.constant 4 : index
    %c0_11 = arith.constant 0 : index
    %11 = vector.load %arg3[%c4, %c0_11] : memref<8x16xf32, #tpu.memory_space<vmem>>, vector<1x16xf32>
    %c5 = arith.constant 5 : index
    %c0_12 = arith.constant 0 : index
    %12 = vector.load %arg3[%c5, %c0_12] : memref<8x16xf32, #tpu.memory_space<vmem>>, vector<1x16xf32>
    %c6 = arith.constant 6 : index
    %c0_13 = arith.constant 0 : index
    %13 = vector.load %arg3[%c6, %c0_13] : memref<8x16xf32, #tpu.memory_space<vmem>>, vector<1x16xf32>
    %c7 = arith.constant 7 : index
    %c0_14 = arith.constant 0 : index
    %14 = vector.load %arg3[%c7, %c0_14] : memref<8x16xf32, #tpu.memory_space<vmem>>, vector<1x16xf32>
    %c0_15 = arith.constant 0 : index
    %c0_16 = arith.constant 0 : index
    %15 = vector.load %arg4[%c0_15, %c0_16] : memref<16x16xf32, #tpu.memory_space<vmem>>, vector<16x16xf32>
    %c0_17 = arith.constant 0 : index
    %c0_18 = arith.constant 0 : index
    %16 = vector.load %arg5[%c0_17, %c0_18] : memref<16x16xf32, #tpu.memory_space<vmem>>, vector<16x16xf32>
    %c0_19 = arith.constant 0 : index
    %c0_20 = arith.constant 0 : index
    %17 = vector.load %arg6[%c0_19, %c0_20] : memref<1x16xf32, #tpu.memory_space<vmem>>, vector<1x16xf32>
    %c0_21 = arith.constant 0 : index
    %c0_22 = arith.constant 0 : index
    %18 = vector.load %arg7[%c0_21, %c0_22] : memref<1x16xf32, #tpu.memory_space<vmem>>, vector<1x16xf32>
    %c0_23 = arith.constant 0 : index
    %c0_24 = arith.constant 0 : index
    %19 = vector.load %arg10[%c0_23, %c0_24] : memref<9x16xf32, #tpu.memory_space<vmem>>, vector<1x16xf32>
    %c1_25 = arith.constant 1 : index
    %c0_26 = arith.constant 0 : index
    %20 = vector.load %arg10[%c1_25, %c0_26] : memref<9x16xf32, #tpu.memory_space<vmem>>, vector<1x16xf32>
    %c2_27 = arith.constant 2 : index
    %c0_28 = arith.constant 0 : index
    %21 = vector.load %arg10[%c2_27, %c0_28] : memref<9x16xf32, #tpu.memory_space<vmem>>, vector<1x16xf32>
    %c3_29 = arith.constant 3 : index
    %c0_30 = arith.constant 0 : index
    %22 = vector.load %arg10[%c3_29, %c0_30] : memref<9x16xf32, #tpu.memory_space<vmem>>, vector<1x16xf32>
    %c4_31 = arith.constant 4 : index
    %c0_32 = arith.constant 0 : index
    %23 = vector.load %arg10[%c4_31, %c0_32] : memref<9x16xf32, #tpu.memory_space<vmem>>, vector<1x16xf32>
    %c5_33 = arith.constant 5 : index
    %c0_34 = arith.constant 0 : index
    %24 = vector.load %arg10[%c5_33, %c0_34] : memref<9x16xf32, #tpu.memory_space<vmem>>, vector<1x16xf32>
    %c6_35 = arith.constant 6 : index
    %c0_36 = arith.constant 0 : index
    %25 = vector.load %arg10[%c6_35, %c0_36] : memref<9x16xf32, #tpu.memory_space<vmem>>, vector<1x16xf32>
    %c7_37 = arith.constant 7 : index
    %c0_38 = arith.constant 0 : index
    %26 = vector.load %arg10[%c7_37, %c0_38] : memref<9x16xf32, #tpu.memory_space<vmem>>, vector<1x16xf32>
    %c8 = arith.constant 8 : index
    %c0_39 = arith.constant 0 : index
    %27 = vector.load %arg10[%c8, %c0_39] : memref<9x16xf32, #tpu.memory_space<vmem>>, vector<1x16xf32>
    %c0_i32_40 = arith.constant 0 : i32
    %c2_i32 = arith.constant 2 : i32
    %28 = arith.addi %c0_i32_40, %c2_i32 : i32
    %c1_i32 = arith.constant 1 : i32
    %29:9 = scf.for %arg11 = %c0_i32_40 to %28 step %c1_i32 iter_args(%arg12 = %19, %arg13 = %20, %arg14 = %21, %arg15 = %22, %arg16 = %23, %arg17 = %24, %arg18 = %25, %arg19 = %26, %arg20 = %27) -> (vector<1x16xf32>, vector<1x16xf32>, vector<1x16xf32>, vector<1x16xf32>, vector<1x16xf32>, vector<1x16xf32>, vector<1x16xf32>, vector<1x16xf32>, vector<1x16xf32>)  : i32 {
      %c8_i32 = arith.constant 8 : i32
      %32 = arith.muli %arg11, %c8_i32 : i32
      %33 = tpu.assume_multiple %32, 8 : i32
      %34 = arith.index_cast %33 : i32 to index
      %c0_44 = arith.constant 0 : index
      %35 = vector.load %arg9[%34, %c0_44] : memref<16x16xf32, #tpu.memory_space<vmem>>, vector<8x16xf32>
      %36 = arith.mulf %arg12, %7 : vector<1x16xf32>
      %37 = arith.mulf %arg13, %8 : vector<1x16xf32>
      %38 = arith.addf %36, %37 : vector<1x16xf32>
      %39 = arith.mulf %arg14, %9 : vector<1x16xf32>
      %40 = arith.addf %38, %39 : vector<1x16xf32>
      %41 = arith.mulf %arg15, %10 : vector<1x16xf32>
      %42 = arith.addf %40, %41 : vector<1x16xf32>
      %43 = arith.mulf %arg16, %11 : vector<1x16xf32>
      %44 = arith.addf %42, %43 : vector<1x16xf32>
      %45 = arith.mulf %arg17, %12 : vector<1x16xf32>
      %46 = arith.addf %44, %45 : vector<1x16xf32>
      %47 = arith.mulf %arg18, %13 : vector<1x16xf32>
      %48 = arith.addf %46, %47 : vector<1x16xf32>
      %49 = arith.mulf %arg19, %14 : vector<1x16xf32>
      %50 = arith.addf %48, %49 : vector<1x16xf32>
      %51 = vector.extract_strided_slice %35 {offsets = [0, 0], sizes = [1, 16], strides = [1, 1]} : vector<8x16xf32> to vector<1x16xf32>
      %52 = arith.addf %51, %arg20 : vector<1x16xf32>
      %53 = arith.addf %52, %50 : vector<1x16xf32>
      %54 = math.tanh %53 : vector<1x16xf32>
      %cst_45 = arith.constant dense<0.000000e+00> : vector<1x16xf32>
      %55 = tpu.matmul %54, %15, %cst_45 {dimension_numbers = #tpu.dot_dimension_numbers<[1], [0], [0], [1], [0, 0, 1, 1], [], []>} : vector<1x16xf32>, vector<16x16xf32>, vector<1x16xf32> -> vector<1x16xf32>
      %56 = arith.addf %55, %17 : vector<1x16xf32>
      %cst_46 = arith.constant dense<0.000000e+00> : vector<1x16xf32>
      %57 = tpu.matmul %54, %16, %cst_46 {dimension_numbers = #tpu.dot_dimension_numbers<[1], [0], [0], [1], [0, 0, 1, 1], [], []>} : vector<1x16xf32>, vector<16x16xf32>, vector<1x16xf32> -> vector<1x16xf32>
      %58 = arith.addf %57, %18 : vector<1x16xf32>
      %59 = arith.mulf %arg13, %7 : vector<1x16xf32>
      %60 = arith.mulf %arg14, %8 : vector<1x16xf32>
      %61 = arith.addf %59, %60 : vector<1x16xf32>
      %62 = arith.mulf %arg15, %9 : vector<1x16xf32>
      %63 = arith.addf %61, %62 : vector<1x16xf32>
      %64 = arith.mulf %arg16, %10 : vector<1x16xf32>
      %65 = arith.addf %63, %64 : vector<1x16xf32>
      %66 = arith.mulf %arg17, %11 : vector<1x16xf32>
      %67 = arith.addf %65, %66 : vector<1x16xf32>
      %68 = arith.mulf %arg18, %12 : vector<1x16xf32>
      %69 = arith.addf %67, %68 : vector<1x16xf32>
      %70 = arith.mulf %arg19, %13 : vector<1x16xf32>
      %71 = arith.addf %69, %70 : vector<1x16xf32>
      %72 = arith.mulf %56, %14 : vector<1x16xf32>
      %73 = arith.addf %71, %72 : vector<1x16xf32>
      %74 = vector.extract_strided_slice %35 {offsets = [1, 0], sizes = [1, 16], strides = [1, 1]} : vector<8x16xf32> to vector<1x16xf32>
      %75 = arith.addf %74, %58 : vector<1x16xf32>
      %76 = arith.addf %75, %73 : vector<1x16xf32>
      %77 = math.tanh %76 : vector<1x16xf32>
      %cst_47 = arith.constant dense<0.000000e+00> : vector<1x16xf32>
      %78 = tpu.matmul %77, %15, %cst_47 {dimension_numbers = #tpu.dot_dimension_numbers<[1], [0], [0], [1], [0, 0, 1, 1], [], []>} : vector<1x16xf32>, vector<16x16xf32>, vector<1x16xf32> -> vector<1x16xf32>
      %79 = arith.addf %78, %17 : vector<1x16xf32>
      %cst_48 = arith.constant dense<0.000000e+00> : vector<1x16xf32>
      %80 = tpu.matmul %77, %16, %cst_48 {dimension_numbers = #tpu.dot_dimension_numbers<[1], [0], [0], [1], [0, 0, 1, 1], [], []>} : vector<1x16xf32>, vector<16x16xf32>, vector<1x16xf32> -> vector<1x16xf32>
      %81 = arith.addf %80, %18 : vector<1x16xf32>
      %82 = arith.mulf %arg14, %7 : vector<1x16xf32>
      %83 = arith.mulf %arg15, %8 : vector<1x16xf32>
      %84 = arith.addf %82, %83 : vector<1x16xf32>
      %85 = arith.mulf %arg16, %9 : vector<1x16xf32>
      %86 = arith.addf %84, %85 : vector<1x16xf32>
      %87 = arith.mulf %arg17, %10 : vector<1x16xf32>
      %88 = arith.addf %86, %87 : vector<1x16xf32>
      %89 = arith.mulf %arg18, %11 : vector<1x16xf32>
      %90 = arith.addf %88, %89 : vector<1x16xf32>
      %91 = arith.mulf %arg19, %12 : vector<1x16xf32>
      %92 = arith.addf %90, %91 : vector<1x16xf32>
      %93 = arith.mulf %56, %13 : vector<1x16xf32>
      %94 = arith.addf %92, %93 : vector<1x16xf32>
      %95 = arith.mulf %79, %14 : vector<1x16xf32>
      %96 = arith.addf %94, %95 : vector<1x16xf32>
      %97 = vector.extract_strided_slice %35 {offsets = [2, 0], sizes = [1, 16], strides = [1, 1]} : vector<8x16xf32> to vector<1x16xf32>
      %98 = arith.addf %97, %81 : vector<1x16xf32>
      %99 = arith.addf %98, %96 : vector<1x16xf32>
      %100 = math.tanh %99 : vector<1x16xf32>
      %cst_49 = arith.constant dense<0.000000e+00> : vector<1x16xf32>
      %101 = tpu.matmul %100, %15, %cst_49 {dimension_numbers = #tpu.dot_dimension_numbers<[1], [0], [0], [1], [0, 0, 1, 1], [], []>} : vector<1x16xf32>, vector<16x16xf32>, vector<1x16xf32> -> vector<1x16xf32>
      %102 = arith.addf %101, %17 : vector<1x16xf32>
      %cst_50 = arith.constant dense<0.000000e+00> : vector<1x16xf32>
      %103 = tpu.matmul %100, %16, %cst_50 {dimension_numbers = #tpu.dot_dimension_numbers<[1], [0], [0], [1], [0, 0, 1, 1], [], []>} : vector<1x16xf32>, vector<16x16xf32>, vector<1x16xf32> -> vector<1x16xf32>
      %104 = arith.addf %103, %18 : vector<1x16xf32>
      %105 = arith.mulf %arg15, %7 : vector<1x16xf32>
      %106 = arith.mulf %arg16, %8 : vector<1x16xf32>
      %107 = arith.addf %105, %106 : vector<1x16xf32>
      %108 = arith.mulf %arg17, %9 : vector<1x16xf32>
      %109 = arith.addf %107, %108 : vector<1x16xf32>
      %110 = arith.mulf %arg18, %10 : vector<1x16xf32>
      %111 = arith.addf %109, %110 : vector<1x16xf32>
      %112 = arith.mulf %arg19, %11 : vector<1x16xf32>
      %113 = arith.addf %111, %112 : vector<1x16xf32>
      %114 = arith.mulf %56, %12 : vector<1x16xf32>
      %115 = arith.addf %113, %114 : vector<1x16xf32>
      %116 = arith.mulf %79, %13 : vector<1x16xf32>
      %117 = arith.addf %115, %116 : vector<1x16xf32>
      %118 = arith.mulf %102, %14 : vector<1x16xf32>
      %119 = arith.addf %117, %118 : vector<1x16xf32>
      %120 = vector.extract_strided_slice %35 {offsets = [3, 0], sizes = [1, 16], strides = [1, 1]} : vector<8x16xf32> to vector<1x16xf32>
      %121 = arith.addf %120, %104 : vector<1x16xf32>
      %122 = arith.addf %121, %119 : vector<1x16xf32>
      %123 = math.tanh %122 : vector<1x16xf32>
      %cst_51 = arith.constant dense<0.000000e+00> : vector<1x16xf32>
      %124 = tpu.matmul %123, %15, %cst_51 {dimension_numbers = #tpu.dot_dimension_numbers<[1], [0], [0], [1], [0, 0, 1, 1], [], []>} : vector<1x16xf32>, vector<16x16xf32>, vector<1x16xf32> -> vector<1x16xf32>
      %125 = arith.addf %124, %17 : vector<1x16xf32>
      %cst_52 = arith.constant dense<0.000000e+00> : vector<1x16xf32>
      %126 = tpu.matmul %123, %16, %cst_52 {dimension_numbers = #tpu.dot_dimension_numbers<[1], [0], [0], [1], [0, 0, 1, 1], [], []>} : vector<1x16xf32>, vector<16x16xf32>, vector<1x16xf32> -> vector<1x16xf32>
      %127 = arith.addf %126, %18 : vector<1x16xf32>
      %128 = arith.mulf %arg16, %7 : vector<1x16xf32>
      %129 = arith.mulf %arg17, %8 : vector<1x16xf32>
      %130 = arith.addf %128, %129 : vector<1x16xf32>
      %131 = arith.mulf %arg18, %9 : vector<1x16xf32>
      %132 = arith.addf %130, %131 : vector<1x16xf32>
      %133 = arith.mulf %arg19, %10 : vector<1x16xf32>
      %134 = arith.addf %132, %133 : vector<1x16xf32>
      %135 = arith.mulf %56, %11 : vector<1x16xf32>
      %136 = arith.addf %134, %135 : vector<1x16xf32>
      %137 = arith.mulf %79, %12 : vector<1x16xf32>
      %138 = arith.addf %136, %137 : vector<1x16xf32>
      %139 = arith.mulf %102, %13 : vector<1x16xf32>
      %140 = arith.addf %138, %139 : vector<1x16xf32>
      %141 = arith.mulf %125, %14 : vector<1x16xf32>
      %142 = arith.addf %140, %141 : vector<1x16xf32>
      %143 = vector.extract_strided_slice %35 {offsets = [4, 0], sizes = [1, 16], strides = [1, 1]} : vector<8x16xf32> to vector<1x16xf32>
      %144 = arith.addf %143, %127 : vector<1x16xf32>
      %145 = arith.addf %144, %142 : vector<1x16xf32>
      %146 = math.tanh %145 : vector<1x16xf32>
      %cst_53 = arith.constant dense<0.000000e+00> : vector<1x16xf32>
      %147 = tpu.matmul %146, %15, %cst_53 {dimension_numbers = #tpu.dot_dimension_numbers<[1], [0], [0], [1], [0, 0, 1, 1], [], []>} : vector<1x16xf32>, vector<16x16xf32>, vector<1x16xf32> -> vector<1x16xf32>
      %148 = arith.addf %147, %17 : vector<1x16xf32>
      %cst_54 = arith.constant dense<0.000000e+00> : vector<1x16xf32>
      %149 = tpu.matmul %146, %16, %cst_54 {dimension_numbers = #tpu.dot_dimension_numbers<[1], [0], [0], [1], [0, 0, 1, 1], [], []>} : vector<1x16xf32>, vector<16x16xf32>, vector<1x16xf32> -> vector<1x16xf32>
      %150 = arith.addf %149, %18 : vector<1x16xf32>
      %151 = arith.mulf %arg17, %7 : vector<1x16xf32>
      %152 = arith.mulf %arg18, %8 : vector<1x16xf32>
      %153 = arith.addf %151, %152 : vector<1x16xf32>
      %154 = arith.mulf %arg19, %9 : vector<1x16xf32>
      %155 = arith.addf %153, %154 : vector<1x16xf32>
      %156 = arith.mulf %56, %10 : vector<1x16xf32>
      %157 = arith.addf %155, %156 : vector<1x16xf32>
      %158 = arith.mulf %79, %11 : vector<1x16xf32>
      %159 = arith.addf %157, %158 : vector<1x16xf32>
      %160 = arith.mulf %102, %12 : vector<1x16xf32>
      %161 = arith.addf %159, %160 : vector<1x16xf32>
      %162 = arith.mulf %125, %13 : vector<1x16xf32>
      %163 = arith.addf %161, %162 : vector<1x16xf32>
      %164 = arith.mulf %148, %14 : vector<1x16xf32>
      %165 = arith.addf %163, %164 : vector<1x16xf32>
      %166 = vector.extract_strided_slice %35 {offsets = [5, 0], sizes = [1, 16], strides = [1, 1]} : vector<8x16xf32> to vector<1x16xf32>
      %167 = arith.addf %166, %150 : vector<1x16xf32>
      %168 = arith.addf %167, %165 : vector<1x16xf32>
      %169 = math.tanh %168 : vector<1x16xf32>
      %cst_55 = arith.constant dense<0.000000e+00> : vector<1x16xf32>
      %170 = tpu.matmul %169, %15, %cst_55 {dimension_numbers = #tpu.dot_dimension_numbers<[1], [0], [0], [1], [0, 0, 1, 1], [], []>} : vector<1x16xf32>, vector<16x16xf32>, vector<1x16xf32> -> vector<1x16xf32>
      %171 = arith.addf %170, %17 : vector<1x16xf32>
      %cst_56 = arith.constant dense<0.000000e+00> : vector<1x16xf32>
      %172 = tpu.matmul %169, %16, %cst_56 {dimension_numbers = #tpu.dot_dimension_numbers<[1], [0], [0], [1], [0, 0, 1, 1], [], []>} : vector<1x16xf32>, vector<16x16xf32>, vector<1x16xf32> -> vector<1x16xf32>
      %173 = arith.addf %172, %18 : vector<1x16xf32>
      %174 = arith.mulf %arg18, %7 : vector<1x16xf32>
      %175 = arith.mulf %arg19, %8 : vector<1x16xf32>
      %176 = arith.addf %174, %175 : vector<1x16xf32>
      %177 = arith.mulf %56, %9 : vector<1x16xf32>
      %178 = arith.addf %176, %177 : vector<1x16xf32>
      %179 = arith.mulf %79, %10 : vector<1x16xf32>
      %180 = arith.addf %178, %179 : vector<1x16xf32>
      %181 = arith.mulf %102, %11 : vector<1x16xf32>
      %182 = arith.addf %180, %181 : vector<1x16xf32>
      %183 = arith.mulf %125, %12 : vector<1x16xf32>
      %184 = arith.addf %182, %183 : vector<1x16xf32>
      %185 = arith.mulf %148, %13 : vector<1x16xf32>
      %186 = arith.addf %184, %185 : vector<1x16xf32>
      %187 = arith.mulf %171, %14 : vector<1x16xf32>
      %188 = arith.addf %186, %187 : vector<1x16xf32>
      %189 = vector.extract_strided_slice %35 {offsets = [6, 0], sizes = [1, 16], strides = [1, 1]} : vector<8x16xf32> to vector<1x16xf32>
      %190 = arith.addf %189, %173 : vector<1x16xf32>
      %191 = arith.addf %190, %188 : vector<1x16xf32>
      %192 = math.tanh %191 : vector<1x16xf32>
      %cst_57 = arith.constant dense<0.000000e+00> : vector<1x16xf32>
      %193 = tpu.matmul %192, %15, %cst_57 {dimension_numbers = #tpu.dot_dimension_numbers<[1], [0], [0], [1], [0, 0, 1, 1], [], []>} : vector<1x16xf32>, vector<16x16xf32>, vector<1x16xf32> -> vector<1x16xf32>
      %194 = arith.addf %193, %17 : vector<1x16xf32>
      %cst_58 = arith.constant dense<0.000000e+00> : vector<1x16xf32>
      %195 = tpu.matmul %192, %16, %cst_58 {dimension_numbers = #tpu.dot_dimension_numbers<[1], [0], [0], [1], [0, 0, 1, 1], [], []>} : vector<1x16xf32>, vector<16x16xf32>, vector<1x16xf32> -> vector<1x16xf32>
      %196 = arith.addf %195, %18 : vector<1x16xf32>
      %197 = arith.mulf %arg19, %7 : vector<1x16xf32>
      %198 = arith.mulf %56, %8 : vector<1x16xf32>
      %199 = arith.addf %197, %198 : vector<1x16xf32>
      %200 = arith.mulf %79, %9 : vector<1x16xf32>
      %201 = arith.addf %199, %200 : vector<1x16xf32>
      %202 = arith.mulf %102, %10 : vector<1x16xf32>
      %203 = arith.addf %201, %202 : vector<1x16xf32>
      %204 = arith.mulf %125, %11 : vector<1x16xf32>
      %205 = arith.addf %203, %204 : vector<1x16xf32>
      %206 = arith.mulf %148, %12 : vector<1x16xf32>
      %207 = arith.addf %205, %206 : vector<1x16xf32>
      %208 = arith.mulf %171, %13 : vector<1x16xf32>
      %209 = arith.addf %207, %208 : vector<1x16xf32>
      %210 = arith.mulf %194, %14 : vector<1x16xf32>
      %211 = arith.addf %209, %210 : vector<1x16xf32>
      %212 = vector.extract_strided_slice %35 {offsets = [7, 0], sizes = [1, 16], strides = [1, 1]} : vector<8x16xf32> to vector<1x16xf32>
      %213 = arith.addf %212, %196 : vector<1x16xf32>
      %214 = arith.addf %213, %211 : vector<1x16xf32>
      %215 = math.tanh %214 : vector<1x16xf32>
      %cst_59 = arith.constant dense<0.000000e+00> : vector<1x16xf32>
      %216 = tpu.matmul %215, %15, %cst_59 {dimension_numbers = #tpu.dot_dimension_numbers<[1], [0], [0], [1], [0, 0, 1, 1], [], []>} : vector<1x16xf32>, vector<16x16xf32>, vector<1x16xf32> -> vector<1x16xf32>
      %217 = arith.addf %216, %17 : vector<1x16xf32>
      %cst_60 = arith.constant dense<0.000000e+00> : vector<1x16xf32>
      %218 = tpu.matmul %215, %16, %cst_60 {dimension_numbers = #tpu.dot_dimension_numbers<[1], [0], [0], [1], [0, 0, 1, 1], [], []>} : vector<1x16xf32>, vector<16x16xf32>, vector<1x16xf32> -> vector<1x16xf32>
      %219 = arith.addf %218, %18 : vector<1x16xf32>
      %220 = tpu.concatenate %56, %79, %102, %125, %148, %171, %194, %217 in 0 : vector<1x16xf32>, vector<1x16xf32>, vector<1x16xf32>, vector<1x16xf32>, vector<1x16xf32>, vector<1x16xf32>, vector<1x16xf32>, vector<1x16xf32> -> vector<8x16xf32>
      %221 = arith.index_cast %33 : i32 to index
      %c0_61 = arith.constant 0 : index
      %222 = vector.load %arg8[%221, %c0_61] : memref<16x16xf32, #tpu.memory_space<vmem>>, vector<8x16xf32>
      tpu.vector_store %arg8[%221, %c0_61], %220 {strides = array<i32>} : memref<16x16xf32, #tpu.memory_space<vmem>>, vector<8x16xf32>,
      scf.yield %56, %79, %102, %125, %148, %171, %194, %217, %219 : vector<1x16xf32>, vector<1x16xf32>, vector<1x16xf32>, vector<1x16xf32>, vector<1x16xf32>, vector<1x16xf32>, vector<1x16xf32>, vector<1x16xf32>, vector<1x16xf32>
    }
    %c2_i32_41 = arith.constant 2 : i32
    %30 = tpu.concatenate %29#0, %29#1, %29#2, %29#3, %29#4, %29#5, %29#6, %29#7, %29#8 in 0 : vector<1x16xf32>, vector<1x16xf32>, vector<1x16xf32>, vector<1x16xf32>, vector<1x16xf32>, vector<1x16xf32>, vector<1x16xf32>, vector<1x16xf32>, vector<1x16xf32> -> vector<9x16xf32>
    %c0_42 = arith.constant 0 : index
    %c0_43 = arith.constant 0 : index
    %31 = vector.load %arg10[%c0_42, %c0_43] : memref<9x16xf32, #tpu.memory_space<vmem>>, vector<9x16xf32>
    tpu.vector_store %arg10[%c0_42, %c0_43], %30 {strides = array<i32>} : memref<9x16xf32, #tpu.memory_space<vmem>>, vector<9x16xf32>,
    return
  }
  func.func @transform_0(%arg0: i32) -> (i32, i32) {
    %c0_i32 = arith.constant 0 : i32
    %c0_i32_0 = arith.constant 0 : i32
    return %arg0, %c0_i32 : i32, i32
  }
  func.func @transform_1(%arg0: i32) -> (i32, i32) {
    %c0_i32 = arith.constant 0 : i32
    %c0_i32_0 = arith.constant 0 : i32
    %c0_i32_1 = arith.constant 0 : i32
    return %c0_i32, %c0_i32_0 : i32, i32
  }
  func.func @transform_2(%arg0: i32) -> (i32, i32) {
    %c0_i32 = arith.constant 0 : i32
    %c0_i32_0 = arith.constant 0 : i32
    %c0_i32_1 = arith.constant 0 : i32
    return %c0_i32, %c0_i32_0 : i32, i32
  }
  func.func @transform_3(%arg0: i32) -> (i32, i32) {
    %c0_i32 = arith.constant 0 : i32
    %c0_i32_0 = arith.constant 0 : i32
    %c0_i32_1 = arith.constant 0 : i32
    return %c0_i32, %c0_i32_0 : i32, i32
  }
  func.func @transform_4(%arg0: i32) -> (i32, i32) {
    %c0_i32 = arith.constant 0 : i32
    %c0_i32_0 = arith.constant 0 : i32
    %c0_i32_1 = arith.constant 0 : i32
    return %c0_i32, %c0_i32_0 : i32, i32
  }
  func.func @transform_5(%arg0: i32) -> (i32, i32) {
    %c0_i32 = arith.constant 0 : i32
    %c0_i32_0 = arith.constant 0 : i32
    %c0_i32_1 = arith.constant 0 : i32
    return %c0_i32, %c0_i32_0 : i32, i32
  }
  func.func @transform_6(%arg0: i32) -> (i32, i32) {
    %c0_i32 = arith.constant 0 : i32
    %c0_i32_0 = arith.constant 0 : i32
    %c0_i32_1 = arith.constant 0 : i32
    return %c0_i32, %c0_i32_0 : i32, i32
  }
  func.func @transform_7(%arg0: i32) -> (i32, i32) {
    %c0_i32 = arith.constant 0 : i32
    %c0_i32_0 = arith.constant 0 : i32
    return %arg0, %c0_i32 : i32, i32
  }
}

</mosaic_0001>

<bundles_post_ra>
// kernel: tpu_custom_call.1
= control target key start
LH: loop header
LB: loop body
LE: loop exit
PB: predicated region body
PF: predicated region fallthrough
CT: control target
= control target key end

     0   :  { %s2412_s24 = smov 0   ;;  %s2911_s0 = inlined_call_operand.vmem [shape: f32[32,112], index: 0, kind: input, shape index: {}]   ;;  %s2912_s1 = inlined_call_operand.vmem [shape: f32[112,16], index: 1, kind: input, shape index: {}]   ;;  %s2913_s2 = inlined_call_operand.vmem [shape: f32[8,16], index: 2, kind: input, shape index: {}]   ;;  %s2914_s3 = inlined_call_operand.vmem [shape: f32[16,16], index: 3, kind: input, shape index: {}]   ;;  %s2915_s4 = inlined_call_operand.vmem [shape: f32[16,16], index: 4, kind: input, shape index: {}]   ;;  %s2916_s5 = inlined_call_operand.vmem [shape: f32[1,16], index: 5, kind: input, shape index: {}]   ;;  %s2917_s6 = inlined_call_operand.vmem [shape: f32[1,16], index: 6, kind: input, shape index: {}]   ;;  %s2918_s7 = inlined_call_operand.vmem [shape: f32[32,16], index: 7, kind: output, shape index: {}]  }
   0x1 LB: > { %s1936_s25 = sadd.s32 4294967295, %s2327_s24   ;;  %p1940_p0 = scmp.ge.s32.totalorder %s2327_s24, 1  ;;  %s2327_s24 = sphi %s2412_s24, %s17_s24  }
   0x2   : > { %p238_p1 = scmp.lt.s32.totalorder %s2327_s24, 3 }
   0x4   : > { %p239_p2 = pnand %p1940_p0, %p238_p1 }
   0x5   : > { %s1941_s26 = sshll.u32 (!%p239_p2), %s1936_s25, 1  ;;  %p1945_p4 = scmp.ne.s32.totalorder (!%p239_p2), %s1936_s25, 0 }
   0x6   : > { %242 = sbr.rel (%p239_p2) target bundleno = 2008 (0x7d8), region = 48  ;;  %p271_p3 = scmp.lt.s32.totalorder (!%p239_p2), %s1941_s26, 3 }
   0xb   : > { %s2921_s26 = smov (!%p271_p3, %s1941_s26), 3  ;;  %285 = sbr.rel (%p1945_p4) target bundleno = 19 (0x13), region = 52 }
   0xc   : > { %s1942_s27 = sshll.u32 %s2921_s26, 3 }
   0xd   : > { %s2423_s30 = scalar_lea.vmem %s2911_s0, %s1942_s27  ;;  %s2428_s10 = scalar_lea.vmem %s2918_s7, %s1942_s27 }
  0x10   : > { %vm286_vm0 = vcmask 130048   ;;  %vm288_vm1 = vcmask 122880   ;;  %v2369_v0 = vmov 0.0  }
  0x11   : > { %287 = vst.msk [vmem:[#allocation3] sm:$0xff] %vm286_vm0, %v2369_v0 }
  0x12   : > { %289 = vst.msk [vmem:[#allocation3 + $0x8] sm:$0x1] %vm288_vm1, %v2369_v0 }
  0x13 PF: > { %v305_v1 = vld [vmem:[%s2912_s1 + $0x68] sm:$0xff]  ;;  %v304_v2 = vld [vmem:[%s2912_s1 + $0x60] sm:$0xff]  ;;  %v303_v3 = vld [vmem:[%s2912_s1 + $0x58] sm:$0xff]  ;;  %vm306_vm2 = vcmask 916480   ;;  %vm388_vm3 = vcmask 130048   ;;  %s2566_s26 = smov 0  }
  0x14   : > { %2031 = vmatprep.subr.mxu0 %v305_v1  ;;  %v302_v4 = vld [vmem:[%s2912_s1 + $0x50] sm:$0xff]  ;;  %v290_v5 = vld [vmem:[%s2423_s30] sm:$0xff]  ;;  %v301_v6 = vld [vmem:[%s2912_s1 + $0x48] sm:$0xff] }
  0x15   : > { %2032 = vmatpush3.msra.mxu0 %v305_v1  ;;  %2059 = vmatprep.mubr.msk.f32.mxu0 %vm306_vm2, %v290_v5  ;;  %v300_v7 = vld [vmem:[%s2912_s1 + $0x40] sm:$0xff]  ;;  %v299_v8 = vld [vmem:[%s2912_s1 + $0x38] sm:$0xff]  ;;  %v298_v9 = vld [vmem:[%s2912_s1 + $0x30] sm:$0xff] }
  0x16   : > { %2033 = vmatprep.subr.mxu0 %v304_v2  ;;  %v297_v10 = vld [vmem:[%s2912_s1 + $0x28] sm:$0xff]  ;;  %v296_v11 = vld [vmem:[%s2912_s1 + $0x20] sm:$0xff]  ;;  %v295_v12 = vld [vmem:[%s2912_s1 + $0x18] sm:$0xff] }
  0x17   : > { %2034 = vmatpush3.msra.mxu0 %v304_v2  ;;  %v294_v13 = vld [vmem:[%s2912_s1 + $0x10] sm:$0xff]  ;;  %v293_v14 = vld [vmem:[%s2912_s1 + $0x8] sm:$0xff]  ;;  %v292_v15 = vld [vmem:[%s2912_s1] sm:$0xff] }
  0x18   : > { %2035 = vmatprep.subr.mxu0 %v303_v3  ;;  %v291_v16 = vld [vmem:[%s2423_s30 + $0x8] sm:$0xff]  ;;  %v2479_v17 = vld [vmem:[%s2913_s2] sm:$0x1]  ;;  %v2484_v18 = vld [vmem:[%s2913_s2 + $0x1] sm:$0x1] }
  0x19   : > { %2036 = vmatpush3.msra.mxu0 %v303_v3  ;;  %v2489_v19 = vld [vmem:[%s2913_s2 + $0x2] sm:$0x1]  ;;  %v2494_v20 = vld [vmem:[%s2913_s2 + $0x3] sm:$0x1]  ;;  %v2499_v21 = vld [vmem:[%s2913_s2 + $0x4] sm:$0x1] }
  0x1a   : > { %2037 = vmatprep.subr.mxu0 %v302_v4  ;;  %v2504_v22 = vld [vmem:[%s2913_s2 + $0x5] sm:$0x1]  ;;  %v2509_v23 = vld [vmem:[%s2913_s2 + $0x6] sm:$0x1]  ;;  %v2514_v24 = vld [vmem:[%s2913_s2 + $0x7] sm:$0x1] }
  0x1b   : > { %2038 = vmatpush3.msra.mxu0 %v302_v4  ;;  %v2519_v25 = vld [vmem:[%s2914_s3] sm:$0xff]  ;;  %v2524_v26 = vld [vmem:[%s2914_s3 + $0x8] sm:$0xff]  ;;  %v405_v31 = vld [vmem:[#allocation3] sm:$0x1]  }
  0x1c   : > { %2039 = vmatprep.subr.mxu0 %v301_v6  ;;  %v2529_v27 = vld [vmem:[%s2915_s4] sm:$0xff]  ;;  %v2534_v28 = vld [vmem:[%s2915_s4 + $0x8] sm:$0xff]  ;;  %v406_v32 = vld [vmem:[#allocation3 + $0x1] sm:$0x1]  }
  0x1d   : > { %2040 = vmatpush3.msra.mxu0 %v301_v6  ;;  %v2539_v29 = vld [vmem:[%s2916_s5] sm:$0x1]  ;;  %v407_v33 = vld [vmem:[#allocation3 + $0x2] sm:$0x1]   ;;  %v408_v34 = vld [vmem:[#allocation3 + $0x3] sm:$0x1]  }
  0x1e   : > { %2041 = vmatprep.subr.mxu0 %v300_v7  ;;  %v2544_v30 = vld [vmem:[%s2917_s6] sm:$0x1]  ;;  %v409_v35 = vld [vmem:[#allocation3 + $0x4] sm:$0x1]   ;;  %v410_v36 = vld [vmem:[#allocation3 + $0x5] sm:$0x1]  }
  0x1f   : > { %2042 = vmatpush3.msra.mxu0 %v300_v7  ;;  %v411_v37 = vld [vmem:[#allocation3 + $0x6] sm:$0x1]   ;;  %v412_v38 = vld [vmem:[#allocation3 + $0x7] sm:$0x1]   ;;  %v413_v39 = vld [vmem:[#allocation3 + $0x8] sm:$0x1]  }
  0x20   : > { %2043 = vmatprep.subr.mxu0 %v299_v8 }
  0x21   : > { %2044 = vmatpush3.msra.mxu0 %v299_v8 }
  0x22   : > { %2045 = vmatprep.subr.mxu0 %v298_v9 }
  0x23   : > { %2046 = vmatpush3.msra.mxu0 %v298_v9 }
  0x24   : > { %2047 = vmatprep.subr.mxu0 %v297_v10 }
  0x25   : > { %2048 = vmatpush3.msra.mxu0 %v297_v10 }
  0x26   : > { %2049 = vmatprep.subr.mxu0 %v296_v11 }
  0x27   : > { %2050 = vmatpush3.msra.mxu0 %v296_v11 }
  0x28   : > { %2051 = vmatprep.subr.mxu0 %v295_v12 }
  0x29   : > { %2052 = vmatpush3.msra.mxu0 %v295_v12 }
  0x2a   : > { %2053 = vmatprep.subr.mxu0 %v294_v13 }
  0x2b   : > { %2054 = vmatpush3.msra.mxu0 %v294_v13 }
  0x2c   : > { %2055 = vmatprep.subr.mxu0 %v293_v14 }
  0x2d   : > { %2056 = vmatpush3.msra.mxu0 %v293_v14 }
  0x2e   : > { %2057 = vmatprep.subr.mxu0 %v292_v15 }
  0x2f   : > { %2058 = vmatpush3.msra.mxu0 %v292_v15 }
  0x30   : > { %2060 = vmatmul.mubr.msk.f32.vlgmr.msra.gmra.mxu0 %vm306_vm2, %v291_v16 }
  0xf0   : > { %v2061_v40 = vpop.f32.mrf.mxu0 }
  0xf1   : > { %390 = vst.msk [vmem:[#allocation2 + $0x8] sm:$0xff] %vm388_vm3, %v2061_v40 }
  0xf2   : > { %v379_v41 = vpop.f32.mrf.mxu0 }
  0xf3   : > { %389 = vst.msk [vmem:[#allocation2] sm:$0xff] %vm388_vm3, %v379_v41 }
  0xf4 LB: >> { %v2370_v42 = vmov 0.0   ;;  %vm2371_vm4 = vmmov 0   ;;  %v432_v43 = vmul.f32 %v2363_v31, %v2479_v17  ;;  %v433_v44 = vmul.f32 %v2359_v32, %v2484_v18  ;;  %s1948_s27 = sshll.u32 %s2367_s26, 3  ;;  %s419_s26 = sadd.s32 1, %s2367_s26   ;;  %s2367_s26 = sphi %s2566_s26, %s419_s26   ;;  %v2363_v31 = vphi %v405_v31, %v2654_v31   ;;  %v2359_v32 = vphi %v406_v32, %v2689_v32   ;;  %v2355_v33 = vphi %v407_v33, %v2761_v33   ;;  %v2351_v34 = vphi %v408_v34, %v2793_v34   ;;  %v2347_v35 = vphi %v409_v35, %v2821_v35   ;;  %v2343_v36 = vphi %v410_v36, %v2847_v36   ;;  %v2339_v37 = vphi %v411_v37, %v1528_v37   ;;  %v2335_v38 = vphi %v412_v38, %v1696_v38   ;;  %v2331_v39 = vphi %v413_v39, %v2919_v39  }
  0xf5   : >> { %2062 = vmatprep.subr.mxu0 %v2370_v42  ;;  %2069 = vmatprep.subr.mxu1 %v2370_v42  ;;  %v435_v45 = vmul.f32 %v2355_v33, %v2489_v19  ;;  %v437_v47 = vmul.f32 %v2351_v34, %v2494_v20  ;;  %v439_v49 = vmul.f32 %v2347_v35, %v2499_v21  ;;  %s430_s28 = scalar_lea.vmem [#allocation2], %s1948_s27  ;;  %vm1790_vm5 = vcmask 1040384   ;;  %s1804_s29 = scalar_lea.vmem %s2428_s10, %s1948_s27 }
  0xf6   : >> { %2063 = vmatpush3.msra.mxu0 %v2524_v26  ;;  %2070 = vmatpush3.msra.mxu1 %v2534_v28  ;;  %v434_v46 = vadd.f32 %v433_v44, %v432_v43  ;;  %v441_v51 = vmul.f32 %v2343_v36, %v2504_v22  ;;  %v443_v53 = vmul.f32 %v2339_v37, %v2509_v23  ;;  %vm1792_vm6 = vcmask 1041408   ;;  %p416_p5 = scmp.ge.s32.totalorder %s419_s26, 2  }
  0xf7   : >> { %2064 = vmatprep.subr.mxu0 %v2370_v42  ;;  %2071 = vmatprep.subr.mxu1 %v2370_v42  ;;  %v445_v56 = vmul.f32 %v2335_v38, %v2514_v24  ;;  %v593_v62 = vmul.f32 %v2359_v32, %v2479_v17  ;;  %v594_v63 = vmul.f32 %v2355_v33, %v2484_v18  ;;  %vm1794_vm7 = vcmask 1042432  }
  0xf8   : >> { %2065 = vmatpush3.msra.mxu0 %v2519_v25  ;;  %2066 = vmatprep.mubr.msk.f32.mxu0 %vm2371_vm4, %v2370_v42  ;;  %v436_v48 = vadd.f32 %v435_v45, %v434_v46  ;;  %v596_v1 = vmul.f32 %v2351_v34, %v2489_v19  ;;  %v598_v3 = vmul.f32 %v2347_v35, %v2494_v20  ;;  %vm1796_vm8 = vcmask 1043456  }
  0xf9   : >> { %2072 = vmatpush3.msra.mxu1 %v2529_v27  ;;  %2073 = vmatprep.mubr.msk.f32.mxu1 %vm2371_vm4, %v2370_v42  ;;  %v595_v0 = vadd.f32 %v594_v63, %v593_v62  ;;  %v600_v5 = vmul.f32 %v2343_v36, %v2499_v21  ;;  %v602_v7 = vmul.f32 %v2339_v37, %v2504_v22  ;;  %vm1798_vm9 = vcmask 1044480  }
  0xfa   : >> { %2076 = vmatprep.subr.mxu0 %v2370_v42  ;;  %2083 = vmatprep.subr.mxu1 %v2370_v42  ;;  %v438_v50 = vadd.f32 %v437_v47, %v436_v48  ;;  %v2621_v54 = vld [vmem:[%s430_s28] sm:$0xff]  ;;  %v604_v9 = vmul.f32 %v2335_v38, %v2509_v23  ;;  %v761_v46 = vmul.f32 %v2355_v33, %v2479_v17  ;;  %vm1800_vm10 = vcmask 1045504  }
  0xfb   : >> { %v447_v58 = vadd.f32 %v2331_v39, %v2621_v54  ;;  %v597_v2 = vadd.f32 %v596_v1, %v595_v0  ;;  %v762_v47 = vmul.f32 %v2351_v34, %v2484_v18  ;;  %vm1802_vm11 = vcmask 1046528  }
  0xfc   : >> { %v440_v52 = vadd.f32 %v439_v49, %v438_v50  ;;  %v764_v49 = vmul.f32 %v2347_v35, %v2489_v19  ;;  %vm1842_vm12 = vcmask (%p416_p5), 122880  }
  0xfd   : >> { %v599_v4 = vadd.f32 %v598_v3, %v597_v2  ;;  %v763_v48 = vadd.f32 %v762_v47, %v761_v46  ;;  %v1268_v46 = vmul.f32 %v2335_v38, %v2489_v19  ;;  %v1433_v47 = vmul.f32 %v2339_v37, %v2479_v17 }
  0xfe   : >> { %v442_v55 = vadd.f32 %v441_v51, %v440_v52  ;;  %v766_v51 = vmul.f32 %v2343_v36, %v2494_v20 }
  0xff   : >> { %v601_v6 = vadd.f32 %v600_v5, %v599_v4  ;;  %v765_v50 = vadd.f32 %v764_v49, %v763_v48 }
 0x100   : >> { %v444_v57 = vadd.f32 %v443_v53, %v442_v55  ;;  %v768_v53 = vmul.f32 %v2339_v37, %v2499_v21 }
 0x101   : >> { %v603_v8 = vadd.f32 %v602_v7, %v601_v6  ;;  %v767_v52 = vadd.f32 %v766_v51, %v765_v50 }
 0x102   : >> { %v446_v59 = vadd.f32 %v445_v56, %v444_v57  ;;  %v770_v56 = vmul.f32 %v2335_v38, %v2504_v22 }
 0x103   : >> { %v605_v13 = vadd.f32 %v604_v9, %v603_v8  ;;  %v769_v55 = vadd.f32 %v768_v53, %v767_v52  ;;  %v929_v8 = vmul.f32 %v2351_v34, %v2479_v17  ;;  %v930_v9 = vmul.f32 %v2347_v35, %v2484_v18 }
 0x104   : >> { %v448_v60 = vadd.f32 %v447_v58, %v446_v59  ;;  %v1100_v34 = vmul.f32 %v2339_v37, %v2489_v19 }
 0x105   : >> { %v771_v33 = vadd.f32 %v770_v56, %v769_v55 }
 0x106   : >> { %2265 = vtanh.f32 %v448_v60 }
 0x113   : >> { %v2266_v61 = vpop.eup %2265 }
 0x114   : >> { %2067 = vmatmul.mubr.msk.f32.vlgmr.msra.gmra.mxu0 %vm388_vm3, %v2266_v61  ;;  %2074 = vmatmul.mubr.msk.f32.vlgmr.msra.gmra.mxu1 %vm388_vm3, %v2266_v61 }
 0x115   : >> { %2077 = vmatpush3.msra.mxu0 %v2524_v26  ;;  %2084 = vmatpush3.msra.mxu1 %v2534_v28 }
 0x116   : >> { %2078 = vmatprep.subr.mxu0 %v2370_v42  ;;  %2085 = vmatprep.subr.mxu1 %v2370_v42 }
 0x117   : >> { %2079 = vmatpush3.msra.mxu0 %v2519_v25  ;;  %2080 = vmatprep.mubr.msk.f32.mxu0 %vm2371_vm4, %v2370_v42 }
 0x118   : >> { %2086 = vmatpush3.msra.mxu1 %v2529_v27  ;;  %2087 = vmatprep.mubr.msk.f32.mxu1 %vm2371_vm4, %v2370_v42 }
 0x119   : >> { %2090 = vmatprep.subr.mxu0 %v2370_v42  ;;  %2097 = vmatprep.subr.mxu1 %v2370_v42 }
 0x1d4   : >> { %v519_v10 = vpop.f32.mrf.mxu0  ;;  %v589_v11 = vpop.f32.mrf.mxu1 }
 0x1d5   : >> { %v2654_v31 = vadd.f32 %v519_v10, %v2539_v29   ;;  %v590_v12 = vadd.f32 %v589_v11, %v2544_v30  ;;  %v931_v10 = vadd.f32 %v930_v9, %v929_v8  ;;  %v932_v11 = vmul.f32 %v2343_v36, %v2489_v19 }
 0x1d6   : >> { %v2068_v14 = vpop.f32.mrf.mxu0  ;;  %v2075_v15 = vpop.f32.mrf.mxu1 }
 0x1d7   : >> { %v606_v16 = vmul.f32 %v2654_v31, %v2514_v24  ;;  %v609_v32 = vrot.slane %v590_v12, 7  ;;  %v772_v57 = vmul.f32 %v2654_v31, %v2509_v23  ;;  %v1097_v12 = vmul.f32 %v2347_v35, %v2479_v17 }
 0x1d8   : >> { %v933_v14 = vadd.f32 %v932_v11, %v931_v10  ;;  %v934_v15 = vmul.f32 %v2339_v37, %v2494_v20  ;;  %v936_v35 = vmul.f32 %v2335_v38, %v2499_v21  ;;  %v938_v50 = vmul.f32 %v2654_v31, %v2504_v22 }
 0x1d9   : >> { %v607_v39 = vadd.f32 %v606_v16, %v605_v13  ;;  %v611_v40 = vadd.f32 %v609_v32, %v2621_v54  ;;  %v773_v63 = vadd.f32 %v772_v57, %v771_v33  ;;  %v1098_v13 = vmul.f32 %v2343_v36, %v2484_v18 }
 0x1da   : >> { %v1104_v51 = vmul.f32 %v2654_v31, %v2499_v21  ;;  %v1270_v53 = vmul.f32 %v2654_v31, %v2494_v20  ;;  %v1436_v56 = vmul.f32 %v2654_v31, %v2489_v19  ;;  %v1602_v33 = vmul.f32 %v2654_v31, %v2484_v18 }
 0x1db   : >> { %v613_v41 = vrot.slane %v607_v39, 7  ;;  %v1099_v16 = vadd.f32 %v1098_v13, %v1097_v12  ;;  %v1265_v39 = vmul.f32 %v2343_v36, %v2479_v17  ;;  %v1434_v36 = vmul.f32 %v2335_v38, %v2484_v18 }
 0x1dd   : >> { %v615_v43 = vadd.f32 %v613_v41, %v611_v40  ;;  %v1266_v40 = vmul.f32 %v2339_v37, %v2484_v18  ;;  %v935_v41 = vadd.f32 %v934_v15, %v933_v14  ;;  %v1435_v55 = vadd.f32 %v1434_v36, %v1433_v47 }
 0x1de   : >> { %v1601_v37 = vmul.f32 %v2335_v38, %v2479_v17 }
 0x1df   : >> { %2267 = vtanh.f32 %v615_v43  ;;  %v1101_v43 = vadd.f32 %v1100_v34, %v1099_v16  ;;  %v937_v48 = vadd.f32 %v936_v35, %v935_v41 }
 0x1ec   : >> { %v2268_v44 = vpop.eup %2267 }
 0x1ed   : >> { %v618_v45 = vrot.slane %v2268_v44, 1  ;;  %v1102_v44 = vmul.f32 %v2335_v38, %v2494_v20 }
 0x1ef   : >> { %2081 = vmatmul.mubr.msk.f32.vlgmr.msra.gmra.mxu0 %vm388_vm3, %v618_v45  ;;  %2088 = vmatmul.mubr.msk.f32.vlgmr.msra.gmra.mxu1 %vm388_vm3, %v618_v45  ;;  %v1267_v45 = vadd.f32 %v1266_v40, %v1265_v39  ;;  %v1103_v49 = vadd.f32 %v1102_v44, %v1101_v43 }
 0x1f0   : >> { %2091 = vmatpush3.msra.mxu0 %v2524_v26  ;;  %2098 = vmatpush3.msra.mxu1 %v2534_v28 }
 0x1f1   : >> { %2092 = vmatprep.subr.mxu0 %v2370_v42  ;;  %2099 = vmatprep.subr.mxu1 %v2370_v42  ;;  %v1269_v52 = vadd.f32 %v1268_v46, %v1267_v45  ;;  %v1105_v38 = vadd.f32 %v1104_v51, %v1103_v49 }
 0x1f2   : >> { %2093 = vmatpush3.msra.mxu0 %v2519_v25  ;;  %2094 = vmatprep.mubr.msk.f32.mxu0 %vm2371_vm4, %v2370_v42 }
 0x1f3   : >> { %2100 = vmatpush3.msra.mxu1 %v2529_v27  ;;  %2101 = vmatprep.mubr.msk.f32.mxu1 %vm2371_vm4, %v2370_v42 }
 0x1f4   : >> { %2104 = vmatprep.subr.mxu0 %v2370_v42  ;;  %2111 = vmatprep.subr.mxu1 %v2370_v42 }
 0x2af   : >> { %v687_v58 = vpop.f32.mrf.mxu0  ;;  %v757_v59 = vpop.f32.mrf.mxu1 }
 0x2b0   : >> { %v2689_v32 = vadd.f32 %v687_v58, %v2539_v29   ;;  %v758_v60 = vadd.f32 %v757_v59, %v2544_v30 }
 0x2b1   : >> { %v2082_v61 = vpop.f32.mrf.mxu0  ;;  %v2089_v62 = vpop.f32.mrf.mxu1 }
 0x2b2   : >> { %v774_v0 = vmul.f32 %v2689_v32, %v2514_v24  ;;  %v777_v1 = vrot.slane %v758_v60, 6  ;;  %v940_v57 = vmul.f32 %v2689_v32, %v2509_v23  ;;  %v1106_v58 = vmul.f32 %v2689_v32, %v2504_v22 }
 0x2b3   : >> { %v1272_v59 = vmul.f32 %v2689_v32, %v2499_v21  ;;  %v1438_v60 = vmul.f32 %v2689_v32, %v2494_v20  ;;  %v1604_v61 = vmul.f32 %v2689_v32, %v2489_v19  ;;  %v939_v62 = vadd.f32 %v938_v50, %v937_v48 }
 0x2b4   : >> { %v775_v2 = vadd.f32 %v774_v0, %v773_v63  ;;  %v779_v3 = vadd.f32 %v777_v1, %v2621_v54  ;;  %v1271_v63 = vadd.f32 %v1270_v53, %v1269_v52 }
 0x2b6   : >> { %v781_v4 = vrot.slane %v775_v2, 6  ;;  %v1437_v2 = vadd.f32 %v1436_v56, %v1435_v55  ;;  %v1273_v10 = vadd.f32 %v1272_v59, %v1271_v63 }
 0x2b8   : >> { %v783_v5 = vadd.f32 %v781_v4, %v779_v3  ;;  %v1603_v3 = vadd.f32 %v1602_v33, %v1601_v37  ;;  %v1770_v4 = vrot.slane %v2689_v32, 7  ;;  %v1439_v11 = vadd.f32 %v1438_v60, %v1437_v2 }
 0x2ba   : >> { %2269 = vtanh.f32 %v783_v5  ;;  %v1605_v12 = vadd.f32 %v1604_v61, %v1603_v3  ;;  %v1791_v41 = vsel %vm1790_vm5, %v2654_v31, %v1770_v4 }
 0x2c7   : >> { %v2270_v6 = vpop.eup %2269 }
 0x2c8   : >> { %v786_v7 = vrot.slane %v2270_v6, 2  ;;  %v941_v6 = vadd.f32 %v940_v57, %v939_v62 }
 0x2ca   : >> { %2095 = vmatmul.mubr.msk.f32.vlgmr.msra.gmra.mxu0 %vm388_vm3, %v786_v7  ;;  %2102 = vmatmul.mubr.msk.f32.vlgmr.msra.gmra.mxu1 %vm388_vm3, %v786_v7  ;;  %v1107_v7 = vadd.f32 %v1106_v58, %v1105_v38 }
 0x2cb   : >> { %2105 = vmatpush3.msra.mxu0 %v2524_v26  ;;  %2112 = vmatpush3.msra.mxu1 %v2534_v28 }
 0x2cc   : >> { %2106 = vmatprep.subr.mxu0 %v2370_v42  ;;  %2113 = vmatprep.subr.mxu1 %v2370_v42 }
 0x2cd   : >> { %2107 = vmatpush3.msra.mxu0 %v2519_v25  ;;  %2108 = vmatprep.mubr.msk.f32.mxu0 %vm2371_vm4, %v2370_v42 }
 0x2ce   : >> { %2114 = vmatpush3.msra.mxu1 %v2529_v27  ;;  %2115 = vmatprep.mubr.msk.f32.mxu1 %vm2371_vm4, %v2370_v42 }
 0x2cf   : >> { %2118 = vmatprep.subr.mxu0 %v2370_v42  ;;  %2125 = vmatprep.subr.mxu1 %v2370_v42 }
 0x38a   : >> { %v855_v0 = vpop.f32.mrf.mxu0  ;;  %v925_v1 = vpop.f32.mrf.mxu1 }
 0x38b   : >> { %v2761_v33 = vadd.f32 %v855_v0, %v2539_v29   ;;  %v926_v5 = vadd.f32 %v925_v1, %v2544_v30 }
 0x38c   : >> { %v2096_v8 = vpop.f32.mrf.mxu0  ;;  %v2103_v9 = vpop.f32.mrf.mxu1 }
 0x38d   : >> { %v1773_v13 = vrot.slane %v2761_v33, 6  ;;  %v942_v14 = vmul.f32 %v2761_v33, %v2514_v24  ;;  %v945_v15 = vrot.slane %v926_v5, 5  ;;  %v1108_v16 = vmul.f32 %v2761_v33, %v2509_v23 }
 0x38e   : >> { %v1274_v34 = vmul.f32 %v2761_v33, %v2504_v22  ;;  %v1440_v39 = vmul.f32 %v2761_v33, %v2499_v21  ;;  %v1606_v40 = vmul.f32 %v2761_v33, %v2494_v20 }
 0x38f   : >> { %v943_v35 = vadd.f32 %v942_v14, %v941_v6  ;;  %v1109_v43 = vadd.f32 %v1108_v16, %v1107_v7  ;;  %v1793_v44 = vsel %vm1792_vm6, %v1791_v41, %v1773_v13  ;;  %v947_v36 = vadd.f32 %v945_v15, %v2621_v54 }
 0x390   : >> { %v1275_v45 = vadd.f32 %v1274_v34, %v1273_v10  ;;  %v1441_v46 = vadd.f32 %v1440_v39, %v1439_v11  ;;  %v1607_v47 = vadd.f32 %v1606_v40, %v1605_v12 }
 0x391   : >> { %v949_v48 = vrot.slane %v943_v35, 5 }
 0x393   : >> { %v951_v49 = vadd.f32 %v949_v48, %v947_v36 }
 0x395   : >> { %2271 = vtanh.f32 %v951_v49 }
 0x3a2   : >> { %v2272_v50 = vpop.eup %2271 }
 0x3a3   : >> { %v954_v51 = vrot.slane %v2272_v50, 3 }
 0x3a5   : >> { %2109 = vmatmul.mubr.msk.f32.vlgmr.msra.gmra.mxu0 %vm388_vm3, %v954_v51  ;;  %2116 = vmatmul.mubr.msk.f32.vlgmr.msra.gmra.mxu1 %vm388_vm3, %v954_v51 }
 0x3a6   : >> { %2119 = vmatpush3.msra.mxu0 %v2524_v26  ;;  %2126 = vmatpush3.msra.mxu1 %v2534_v28 }
 0x3a7   : >> { %2120 = vmatprep.subr.mxu0 %v2370_v42  ;;  %2127 = vmatprep.subr.mxu1 %v2370_v42 }
 0x3a8   : >> { %2121 = vmatpush3.msra.mxu0 %v2519_v25  ;;  %2122 = vmatprep.mubr.msk.f32.mxu0 %vm2371_vm4, %v2370_v42 }
 0x3a9   : >> { %2128 = vmatpush3.msra.mxu1 %v2529_v27  ;;  %2129 = vmatprep.mubr.msk.f32.mxu1 %vm2371_vm4, %v2370_v42 }
 0x3aa   : >> { %2132 = vmatprep.subr.mxu0 %v2370_v42  ;;  %2139 = vmatprep.subr.mxu1 %v2370_v42 }
 0x465   : >> { %v1023_v52 = vpop.f32.mrf.mxu0  ;;  %v1093_v53 = vpop.f32.mrf.mxu1 }
 0x466   : >> { %v2793_v34 = vadd.f32 %v1023_v52, %v2539_v29   ;;  %v1094_v55 = vadd.f32 %v1093_v53, %v2544_v30 }
 0x467   : >> { %v2110_v56 = vpop.f32.mrf.mxu0  ;;  %v2117_v37 = vpop.f32.mrf.mxu1 }
 0x468   : >> { %v1776_v57 = vrot.slane %v2793_v34, 5  ;;  %v1110_v58 = vmul.f32 %v2793_v34, %v2514_v24  ;;  %v1113_v59 = vrot.slane %v1094_v55, 4  ;;  %v1276_v60 = vmul.f32 %v2793_v34, %v2509_v23 }
 0x469   : >> { %v1442_v61 = vmul.f32 %v2793_v34, %v2504_v22  ;;  %v1608_v62 = vmul.f32 %v2793_v34, %v2499_v21 }
 0x46a   : >> { %v1111_v38 = vadd.f32 %v1110_v58, %v1109_v43  ;;  %v1277_v63 = vadd.f32 %v1276_v60, %v1275_v45  ;;  %v1795_v0 = vsel %vm1794_vm7, %v1793_v44, %v1776_v57  ;;  %v1115_v3 = vadd.f32 %v1113_v59, %v2621_v54 }
 0x46b   : >> { %v1443_v1 = vadd.f32 %v1442_v61, %v1441_v46  ;;  %v1609_v2 = vadd.f32 %v1608_v62, %v1607_v47 }
 0x46c   : >> { %v1117_v4 = vrot.slane %v1111_v38, 4 }
 0x46e   : >> { %v1119_v5 = vadd.f32 %v1117_v4, %v1115_v3 }
 0x470   : >> { %2273 = vtanh.f32 %v1119_v5 }
 0x47d   : >> { %v2274_v6 = vpop.eup %2273 }
 0x47e   : >> { %v1122_v7 = vrot.slane %v2274_v6, 4 }
 0x480   : >> { %2123 = vmatmul.mubr.msk.f32.vlgmr.msra.gmra.mxu0 %vm388_vm3, %v1122_v7  ;;  %2130 = vmatmul.mubr.msk.f32.vlgmr.msra.gmra.mxu1 %vm388_vm3, %v1122_v7 }
 0x481   : >> { %2133 = vmatpush3.msra.mxu0 %v2524_v26  ;;  %2140 = vmatpush3.msra.mxu1 %v2534_v28 }
 0x482   : >> { %2134 = vmatprep.subr.mxu0 %v2370_v42  ;;  %2141 = vmatprep.subr.mxu1 %v2370_v42 }
 0x483   : >> { %2135 = vmatpush3.msra.mxu0 %v2519_v25  ;;  %2136 = vmatprep.mubr.msk.f32.mxu0 %vm2371_vm4, %v2370_v42 }
 0x484   : >> { %2142 = vmatpush3.msra.mxu1 %v2529_v27  ;;  %2143 = vmatprep.mubr.msk.f32.mxu1 %vm2371_vm4, %v2370_v42 }
 0x485   : >> { %2146 = vmatprep.subr.mxu0 %v2370_v42  ;;  %2153 = vmatprep.subr.mxu1 %v2370_v42 }
 0x540   : >> { %v1191_v8 = vpop.f32.mrf.mxu0  ;;  %v1261_v9 = vpop.f32.mrf.mxu1 }
 0x541   : >> { %v2821_v35 = vadd.f32 %v1191_v8, %v2539_v29   ;;  %v1262_v10 = vadd.f32 %v1261_v9, %v2544_v30 }
 0x542   : >> { %v2124_v11 = vpop.f32.mrf.mxu0  ;;  %v2131_v12 = vpop.f32.mrf.mxu1 }
 0x543   : >> { %v1278_v13 = vmul.f32 %v2821_v35, %v2514_v24  ;;  %v1444_v14 = vmul.f32 %v2821_v35, %v2509_v23  ;;  %v1610_v15 = vmul.f32 %v2821_v35, %v2504_v22  ;;  %v1779_v16 = vrot.slane %v2821_v35, 4 }
 0x544   : >> { %v1281_v39 = vrot.slane %v1262_v10, 3 }
 0x545   : >> { %v1279_v40 = vadd.f32 %v1278_v13, %v1277_v63  ;;  %v1445_v41 = vadd.f32 %v1444_v14, %v1443_v1  ;;  %v1611_v43 = vadd.f32 %v1610_v15, %v1609_v2  ;;  %v1797_v44 = vsel %vm1796_vm8, %v1795_v0, %v1779_v16 }
 0x546   : >> { %v1283_v45 = vadd.f32 %v1281_v39, %v2621_v54 }
 0x547   : >> { %v1285_v46 = vrot.slane %v1279_v40, 3 }
 0x549   : >> { %v1287_v47 = vadd.f32 %v1285_v46, %v1283_v45 }
 0x54b   : >> { %2275 = vtanh.f32 %v1287_v47 }
 0x558   : >> { %v2276_v36 = vpop.eup %2275 }
 0x559   : >> { %v1290_v48 = vrot.slane %v2276_v36, 5 }
 0x55b   : >> { %2137 = vmatmul.mubr.msk.f32.vlgmr.msra.gmra.mxu0 %vm388_vm3, %v1290_v48  ;;  %2144 = vmatmul.mubr.msk.f32.vlgmr.msra.gmra.mxu1 %vm388_vm3, %v1290_v48 }
 0x55c   : >> { %2147 = vmatpush3.msra.mxu0 %v2524_v26  ;;  %2154 = vmatpush3.msra.mxu1 %v2534_v28 }
 0x55d   : >> { %2148 = vmatprep.subr.mxu0 %v2370_v42  ;;  %2155 = vmatprep.subr.mxu1 %v2370_v42 }
 0x55e   : >> { %2149 = vmatpush3.msra.mxu0 %v2519_v25  ;;  %2150 = vmatprep.mubr.msk.f32.mxu0 %vm2371_vm4, %v2370_v42 }
 0x55f   : >> { %2156 = vmatpush3.msra.mxu1 %v2529_v27  ;;  %2157 = vmatprep.mubr.msk.f32.mxu1 %vm2371_vm4, %v2370_v42 }
 0x560   : >> { %2160 = vmatprep.subr.mxu0 %v2370_v42  ;;  %2167 = vmatprep.subr.mxu1 %v2370_v42 }
 0x61b   : >> { %v1359_v49 = vpop.f32.mrf.mxu0  ;;  %v1429_v50 = vpop.f32.mrf.mxu1 }
 0x61c   : >> { %v2847_v36 = vadd.f32 %v1359_v49, %v2539_v29   ;;  %v1430_v51 = vadd.f32 %v1429_v50, %v2544_v30 }
 0x61d   : >> { %v2138_v52 = vpop.f32.mrf.mxu0  ;;  %v2145_v53 = vpop.f32.mrf.mxu1 }
 0x61e   : >> { %v1446_v55 = vmul.f32 %v2847_v36, %v2514_v24  ;;  %v1612_v56 = vmul.f32 %v2847_v36, %v2509_v23  ;;  %v1782_v37 = vrot.slane %v2847_v36, 3  ;;  %v1449_v57 = vrot.slane %v1430_v51, 2 }
 0x620   : >> { %v1447_v58 = vadd.f32 %v1446_v55, %v1445_v41  ;;  %v1613_v59 = vadd.f32 %v1612_v56, %v1611_v43  ;;  %v1799_v60 = vsel %vm1798_vm9, %v1797_v44, %v1782_v37  ;;  %v1451_v61 = vadd.f32 %v1449_v57, %v2621_v54 }
 0x622   : >> { %v1453_v62 = vrot.slane %v1447_v58, 2 }
 0x624   : >> { %v1455_v38 = vadd.f32 %v1453_v62, %v1451_v61 }
 0x626   : >> { %2277 = vtanh.f32 %v1455_v38 }
 0x633   : >> { %v2278_v63 = vpop.eup %2277 }
 0x634   : >> { %v1458_v0 = vrot.slane %v2278_v63, 6 }
 0x636   : >> { %2151 = vmatmul.mubr.msk.f32.vlgmr.msra.gmra.mxu0 %vm388_vm3, %v1458_v0  ;;  %2158 = vmatmul.mubr.msk.f32.vlgmr.msra.gmra.mxu1 %vm388_vm3, %v1458_v0 }
 0x637   : >> { %2161 = vmatpush3.msra.mxu0 %v2524_v26  ;;  %2168 = vmatpush3.msra.mxu1 %v2534_v28 }
 0x638   : >> { %2162 = vmatprep.subr.mxu0 %v2370_v42  ;;  %2169 = vmatprep.subr.mxu1 %v2370_v42 }
 0x639   : >> { %2163 = vmatpush3.msra.mxu0 %v2519_v25  ;;  %2164 = vmatprep.mubr.msk.f32.mxu0 %vm2371_vm4, %v2370_v42 }
 0x63a   : >> { %2170 = vmatpush3.msra.mxu1 %v2529_v27  ;;  %2171 = vmatprep.mubr.msk.f32.mxu1 %vm2371_vm4, %v2370_v42 }
 0x6f6   : >> { %v1527_v1 = vpop.f32.mrf.mxu0  ;;  %v1597_v2 = vpop.f32.mrf.mxu1 }
 0x6f7   : >> { %v1528_v37 = vadd.f32 %v1527_v1, %v2539_v29   ;;  %v1598_v3 = vadd.f32 %v1597_v2, %v2544_v30 }
 0x6f8   : >> { %v2152_v4 = vpop.f32.mrf.mxu0  ;;  %v2159_v5 = vpop.f32.mrf.mxu1 }
 0x6f9   : >> { %v1614_v6 = vmul.f32 %v1528_v37, %v2514_v24  ;;  %v1785_v7 = vrot.slane %v1528_v37, 2  ;;  %v1617_v8 = vrot.slane %v1598_v3, 1 }
 0x6fb   : >> { %v1615_v9 = vadd.f32 %v1614_v6, %v1613_v59  ;;  %v1801_v10 = vsel %vm1800_vm10, %v1799_v60, %v1785_v7  ;;  %v1619_v42 = vadd.f32 %v1617_v8, %v2621_v54 }
 0x6fd   : >> { %v1621_v11 = vrot.slane %v1615_v9, 1 }
 0x6ff   : >> { %v1623_v12 = vadd.f32 %v1621_v11, %v1619_v42 }
 0x701   : >> { %2279 = vtanh.f32 %v1623_v12 }
 0x70e   : >> { %v2280_v13 = vpop.eup %2279 }
 0x70f   : >> { %v1626_v14 = vrot.slane %v2280_v13, 7 }
 0x711   : >> { %2165 = vmatmul.mubr.msk.f32.vlgmr.msra.gmra.mxu0 %vm388_vm3, %v1626_v14  ;;  %2172 = vmatmul.mubr.msk.f32.vlgmr.msra.gmra.mxu1 %vm388_vm3, %v1626_v14 }
 0x7d1   : >> { %v1695_v15 = vpop.f32.mrf.mxu0  ;;  %v1765_v16 = vpop.f32.mrf.mxu1 }
 0x7d2   : >> { %v1696_v38 = vadd.f32 %v1695_v15, %v2539_v29   ;;  %v1766_v40 = vadd.f32 %v1765_v16, %v2544_v30  }
 0x7d3   : >> { %v2166_v39 = vpop.f32.mrf.mxu0  ;;  %v2173_v41 = vpop.f32.mrf.mxu1  ;;  %418 = sbr.rel (!%p416_p5) target bundleno = 244 (0xf4), region = 91 }
 0x7d4   : >> { %v1788_v43 = vrot.slane %v1696_v38, 1  ;;  %v2919_v39 = vmov %v1766_v40  ;;  %1843 = vst.msk [vmem:[#allocation3 + $0x8] sm:$0x1] (%p416_p5), %vm1842_vm12, %v1766_v40 }
 0x7d6   : >> { %v1803_v54 = vsel %vm1802_vm11, %v1801_v10, %v1788_v43 }
 0x7d7   : >> { %1805 = vst.msk [vmem:[%s1804_s29] sm:$0xff] %vm388_vm3, %v1803_v54  ;;  %1841 = vst.msk [vmem:[#allocation3] sm:$0xff] (%p416_p5), %vm388_vm3, %v1803_v54 }
 0x7d8 PF: > { %s17_s24 = sadd.s32 1, %s2327_s24  }
 0x7d9   : > { %p14_p6 = scmp.ge.s32.totalorder %s17_s24, 4  }
 0x7db   :  { %16 = sbr.rel (!%p14_p6) target bundleno = 1 (0x1), region = 102 }

</bundles_post_ra>
